<compile_context>
chip_gen: v7x
topology: tpu7x:2x2x1
jax: 0.10.0
libtpu: 0.0.40
codegen_flags: <defaults>
</compile_context>

<pallas_src>
import functools

import jax
import jax.numpy as jnp
import numpy as np
from jax import lax
from jax.experimental import pallas as pl
from jax.experimental.pallas import tpu as pltpu

CLASS_WEIGHT = 1.0
DISTANCE_WEIGHT = 50.0
SOFT_WEIGHT = True

_LANE = 128
_SUBLANE = 8
_MAX_BLOCK_ROWS = 2048  # 2048 x 128 elements / step (1 MiB f32 per input block)


def _round_up(x, m):
    return ((x + m - 1) // m) * m


def _loss_sums_kernel(pred_ref, tgt_ref, out_ref, *, num_features, block_rows,
                      total_elems, soft_weight):
    """pred/tgt: (block_rows, 128) with the F features interleaved along lanes.

    out: (1, 8, 128) lane partials -- row 0: sum(bce * relevant),
    row 1: sum(weighted position sq-err), row 2: sum(relevant), rows 3..7: 0.
    """
    f = num_features
    pred = pred_ref[...].astype(jnp.float32)
    tgt = tgt_ref[...].astype(jnp.float32)
    rb, lanes = pred.shape

    # Ragged-tail mask: the last grid step's block can run past the (rows, 128)
    # array (stale VMEM) and the final <128 lanes may be flat padding.  Sanitize
    # BEFORE exp/log so garbage can never turn into inf * 0 = NaN.
    row = lax.broadcasted_iota(jnp.int32, (rb, lanes), 0)
    lane = lax.broadcasted_iota(jnp.int32, (rb, lanes), 1)
    flat_idx = (pl.program_id(0) * block_rows + row) * lanes + lane
    valid = flat_idx < total_elems
    pred = jnp.where(valid, pred, 0.0)
    tgt = jnp.where(valid, tgt, 0.0)

    # Lane l holds feature (l % f) of target (l // f); since 128 % f == 0 a
    # target's features never straddle the 128-lane vreg boundary.
    is_logit = (lane % f) == 0
    # NOTE: exact float compare (labels == 1.0) mirrors the PyTorch reference.
    relevant = (is_logit & (tgt == 1.0)).astype(jnp.float32)

    # Stable BCE-with-logits: max(z,0) - z*t + log1p(exp(-|z|)); only logit
    # lanes survive the relevant mask.  exp(-|z|) is shared with the sigmoid.
    e = jnp.exp(-jnp.abs(pred))
    bce = (jnp.maximum(pred, 0.0) - pred * tgt + jnp.log1p(e)) * relevant

    # sigmoid(z) from the shared exp: z >= 0 -> 1/(1+e), z < 0 -> e/(1+e).
    r = 1.0 / (1.0 + e)
    prob = jnp.where(pred >= 0.0, r, e * r)
    w = prob * relevant if soft_weight else relevant  # per-target weight @ logit lane

    if f > 1:
        # Broadcast w from each target's logit lane to its f-1 position lanes.
        # pltpu.roll == jnp.roll (out[j] = in[j - k]), so the value at lane t*f
        # lands on lanes t*f+1 .. t*f+f-1; logit lanes stay 0 because only
        # shifts 1..f-1 are used, and the circular wrap only moves zero lanes.
        w_pos = pltpu.roll(w, shift=1, axis=1)
        for k in range(2, f):
            w_pos = w_pos + pltpu.roll(w, shift=k, axis=1)
        d = pred - tgt
        pos = (d * d) * w_pos * (1.0 / (f - 1))
    else:
        pos = jnp.zeros_like(pred)

    # Per-block lane partials (sublane reduce only); the tiny (grid, 3, 128)
    # scalar reduction is plain JAX glue in the wrapper.
    out_ref[0, 0:1, :] = jnp.sum(bce, axis=0, keepdims=True)
    out_ref[0, 1:2, :] = jnp.sum(pos, axis=0, keepdims=True)
    out_ref[0, 2:3, :] = jnp.sum(relevant, axis=0, keepdims=True)
    out_ref[0, 3:, :] = jnp.zeros((_SUBLANE - 3, lanes), jnp.float32)


def _row_align(outputs, targets):
    itemsize = min(outputs.dtype.itemsize, targets.dtype.itemsize)
    return _SUBLANE * max(1, 4 // int(itemsize))  # 8 rows for f32, 16 for bf16


def _pallas_loss_sums(outputs, targets, soft_weight):
    """Returns (bce_sum, weighted_pos_sum, relevant_count) as f32 scalars."""
    B, T, F = outputs.shape
    total = B * T * F
    rows = pl.cdiv(total, _LANE)

    # Zero-copy relayout: the contiguous (B, T, F) buffer is viewed as
    # (rows, 128) with features interleaved on lanes -- no HBM transpose pass.
    flat_pred = outputs.reshape(-1)
    flat_tgt = targets.reshape(-1)
    pad = rows * _LANE - total
    if pad:
        # TODO(synk): only hit when B*T*F % 128 != 0; forces one XLA pad copy.
        # The tail is masked in-kernel anyway, so the pad value is irrelevant.
        flat_pred = jnp.pad(flat_pred, (0, pad))
        flat_tgt = jnp.pad(flat_tgt, (0, pad))
    pred2d = flat_pred.reshape(rows, _LANE)
    tgt2d = flat_tgt.reshape(rows, _LANE)

    # Block sizing: as big as possible (amortize ~0.35us/step grid overhead)
    # but capped near rows/2 so the single "parallel" axis always has >= 2
    # steps for v7x megacore.  Rows aligned to the sublane tile (8 f32, 16 bf16).
    align = _row_align(outputs, targets)
    block_rows = min(_MAX_BLOCK_ROWS, _round_up(pl.cdiv(rows, 2), align))
    grid = pl.cdiv(rows, block_rows)

    kernel = functools.partial(
        _loss_sums_kernel,
        num_features=F,
        block_rows=block_rows,
        total_elems=total,
        soft_weight=soft_weight,
    )

    partials = pl.pallas_call(
        kernel,
        out_shape=jax.ShapeDtypeStruct((grid, _SUBLANE, _LANE), jnp.float32),
        grid_spec=pltpu.PrefetchScalarGridSpec(
            num_scalar_prefetch=0,
            grid=(grid,),
            in_specs=[
                pl.BlockSpec((block_rows, _LANE), lambda g: (g, 0)),
                pl.BlockSpec((block_rows, _LANE), lambda g: (g, 0)),
            ],
            out_specs=pl.BlockSpec((1, _SUBLANE, _LANE), lambda g: (g, 0, 0)),
        ),
        compiler_params=pltpu.CompilerParams(
            dimension_semantics=("parallel",),  # independent blocks -> both TCs on v7x
            vmem_limit_bytes=32 * 1024 * 1024,
        ),
    )(pred2d, tgt2d)

    sums = jnp.sum(partials[:, :3, :], axis=(0, 2))
    return sums[0], sums[1], sums[2]


def _jnp_loss_sums(outputs, targets, soft_weight):
    """Fused-XLA fallback for tiny inputs / feature counts that don't divide 128."""
    logits = outputs[..., 0].astype(jnp.float32)
    labels = targets[..., 0].astype(jnp.float32)
    relevant = (labels == 1.0).astype(jnp.float32)
    bce = jnp.maximum(logits, 0.0) - logits * labels + jnp.log1p(jnp.exp(-jnp.abs(logits)))
    bce_sum = jnp.sum(bce * relevant)
    if outputs.shape[-1] > 1:
        d = outputs[..., 1:].astype(jnp.float32) - targets[..., 1:].astype(jnp.float32)
        mse = jnp.mean(d * d, axis=-1)
        w = jax.nn.sigmoid(logits) * relevant if soft_weight else relevant
        pos_sum = jnp.sum(mse * w)
    else:
        pos_sum = jnp.zeros((), jnp.float32)
    return bce_sum, pos_sum, jnp.sum(relevant)


@functools.partial(
    jax.jit, static_argnames=("class_weight", "distance_weight", "soft_weight"))
def single_traffic_position_loss(outputs, targets,
                                 class_weight=CLASS_WEIGHT,
                                 distance_weight=DISTANCE_WEIGHT,
                                 soft_weight=SOFT_WEIGHT):
    B, T, F = outputs.shape
    rows = pl.cdiv(B * T * F, _LANE)
    use_pallas = (F >= 2) and (_LANE % F == 0) and (rows >= _row_align(outputs, targets))
    if use_pallas:
        bce_sum, pos_sum, cnt = _pallas_loss_sums(outputs, targets, soft_weight)
    else:
        # Tiny inputs: pallas_call launch + wrapper cost dominates, let XLA fuse it.
        # TODO(synk): feature counts that don't divide 128 also take this path.
        bce_sum, pos_sum, cnt = _jnp_loss_sums(outputs, targets, soft_weight)

    has_relevant = cnt > 0.0
    denom = jnp.where(has_relevant, cnt, 1.0)
    loss_class = jnp.where(has_relevant, bce_sum / denom, 0.0)
    weighted_position_loss = jnp.where(has_relevant, pos_sum / denom, 0.0)
    total_loss = class_weight * loss_class + distance_weight * weighted_position_loss
    # TODO(synk): PyTorch returns python floats via .item(); we return jnp scalars
    # to avoid device->host syncs and keep the whole loss jit-able.
    additional_information = {
        "class_loss": loss_class * class_weight,
        "position_loss": weighted_position_loss * distance_weight,
    }
    return total_loss, additional_information


def _reference_loss(outputs, targets,
                    class_weight=CLASS_WEIGHT,
                    distance_weight=DISTANCE_WEIGHT,
                    soft_weight=SOFT_WEIGHT):
    """Pure-JAX mirror of the PyTorch forward (masked-mean formulation)."""
    outputs = outputs.astype(jnp.float32)
    targets = targets.astype(jnp.float32)
    logits = outputs[:, :, 0]
    labels = targets[:, :, 0]
    mask = (labels == 1.0).astype(jnp.float32)
    cnt = jnp.sum(mask)
    has = cnt > 0.0
    denom = jnp.where(has, cnt, 1.0)

    bce = jnp.maximum(logits, 0.0) - logits * labels + jnp.log1p(jnp.exp(-jnp.abs(logits)))
    loss_class = jnp.where(has, jnp.sum(bce * mask) / denom, 0.0)

    probs = jax.nn.sigmoid(logits)
    diff = outputs[:, :, 1:] - targets[:, :, 1:]
    mse = jnp.mean(diff * diff, axis=-1)
    pos = mse * probs if soft_weight else mse
    weighted_position_loss = jnp.where(has, jnp.sum(pos * mask) / denom, 0.0)

    total = class_weight * loss_class + distance_weight * weighted_position_loss
    return total, class_weight * loss_class, distance_weight * weighted_position_loss


def _make_inputs(key, batch, num_targets, num_features, dtype=jnp.float32):
    k1, k2, k3 = jax.random.split(key, 3)
    outputs = jax.random.normal(k1, (batch, num_targets, num_features), jnp.float32)
    labels = jax.random.bernoulli(k2, 0.5, (batch, num_targets)).astype(jnp.float32)
    labels = labels.at[0, 0].set(1.0)  # ensure at least one relevant target
    positions = jax.random.normal(k3, (batch, num_targets, num_features - 1), jnp.float32)
    targets = jnp.concatenate([labels[..., None], positions], axis=-1)
    return outputs.astype(dtype), targets.astype(dtype)


def _check(outputs, targets, rtol=1e-4, atol=1e-5):
    total, info = single_traffic_position_loss(outputs, targets)
    total = jax.block_until_ready(total)
    ref_total, ref_cls, ref_pos = _reference_loss(outputs, targets)
    np.testing.assert_allclose(np.asarray(total), np.asarray(ref_total),
                               rtol=rtol, atol=atol)
    np.testing.assert_allclose(np.asarray(info["class_loss"]), np.asarray(ref_cls),
                               rtol=rtol, atol=atol)
    np.testing.assert_allclose(np.asarray(info["position_loss"]), np.asarray(ref_pos),
                               rtol=rtol, atol=atol)


if __name__ == "__main__":
    key = jax.random.PRNGKey(0)
    k1, k2, k3, k4 = jax.random.split(key, 4)

    # 1) Pallas path, aligned: 8*256*4 = 8192 elems -> 64 lane-rows, 2 grid steps.
    _check(*_make_inputs(k1, 8, 256, 4))

    # 2) Pallas path, ragged: 5*123*4 = 2460 elems -> flat pad + partial last
    #    block, exercises the in-kernel validity mask.
    _check(*_make_inputs(k2, 5, 123, 4))

    # 3) Pallas path, bf16 inputs (halves HBM traffic; cast to f32 in-kernel).
    _check(*_make_inputs(k3, 8, 256, 4, dtype=jnp.bfloat16))

    # 4) Tiny demo shape from the module (batch=2, max_num_targets=8, features=4):
    #    fused-XLA fast path (pallas launch overhead would dominate).
    _check(*_make_inputs(k4, 2, 8, 4))

    print("KERNEL_OK")
</pallas_src>

<mosaic_0001>
module attributes {stable_mosaic.version = 11 : i64} {
  func.func @_loss_sums_kernel(%arg0: i32, %arg1: memref<32x128xf32, #tpu.memory_space<vmem>>, %arg2: memref<32x128xf32, #tpu.memory_space<vmem>>, %arg3: memref<1x8x128xf32, #tpu.memory_space<vmem>>) attributes {dimension_semantics = [#tpu.dimension_semantics<parallel>], iteration_bounds = array<i64: 2>, scalar_prefetch = 0 : i64, scratch_operands = 0 : i64, tpu.core_type = #tpu.core_type<tc>, window_params = [{transform_indices = @transform_0, window_bounds = array<i64: 32, 128>}, {transform_indices = @transform_1, window_bounds = array<i64: 32, 128>}, {transform_indices = @transform_2, window_bounds = array<i64: 1, 8, 128>}]} {
    %c0 = arith.constant 0 : index
    %c0_0 = arith.constant 0 : index
    %0 = vector.load %arg1[%c0, %c0_0] : memref<32x128xf32, #tpu.memory_space<vmem>>, vector<32x128xf32>
    %c0_1 = arith.constant 0 : index
    %c0_2 = arith.constant 0 : index
    %1 = vector.load %arg2[%c0_1, %c0_2] : memref<32x128xf32, #tpu.memory_space<vmem>>, vector<32x128xf32>
    %2 = tpu.iota {dimensions = array<i32: 0>} : vector<32x128xi32>
    %3 = tpu.iota {dimensions = array<i32: 1>} : vector<32x128xi32>
    %c32_i32 = arith.constant 32 : i32
    %4 = arith.muli %arg0, %c32_i32 : i32
    %5 = vector.broadcast %4 : i32 to vector<32x128xi32>
    %6 = arith.addi %5, %2 : vector<32x128xi32>
    %c128_i32 = arith.constant 128 : i32
    %7 = vector.broadcast %c128_i32 : i32 to vector<32x128xi32>
    %8 = arith.muli %6, %7 : vector<32x128xi32>
    %9 = arith.addi %8, %3 : vector<32x128xi32>
    %c8192_i32 = arith.constant 8192 : i32
    %10 = vector.broadcast %c8192_i32 : i32 to vector<32x128xi32>
    %11 = arith.cmpi slt, %9, %10 : vector<32x128xi32>
    %cst = arith.constant 0.000000e+00 : f32
    %12 = vector.broadcast %cst : f32 to vector<32x128xf32>
    %13 = arith.select %11, %0, %12 : vector<32x128xi1>, vector<32x128xf32>
    %cst_3 = arith.constant 0.000000e+00 : f32
    %14 = vector.broadcast %cst_3 : f32 to vector<32x128xf32>
    %15 = arith.select %11, %1, %14 : vector<32x128xi1>, vector<32x128xf32>
    %c4_i32 = arith.constant 4 : i32
    %c0_i32 = arith.constant 0 : i32
    %16 = arith.cmpi eq, %c4_i32, %c0_i32 : i32
    %c1_i32 = arith.constant 1 : i32
    %17 = arith.select %16, %c1_i32, %c4_i32 : i32
    %18 = vector.broadcast %17 : i32 to vector<32x128xi32>
    %19 = arith.remsi %3, %18 : vector<32x128xi32>
    %c0_i32_4 = arith.constant 0 : i32
    %20 = vector.broadcast %c0_i32_4 : i32 to vector<32x128xi32>
    %21 = arith.cmpi ne, %19, %20 : vector<32x128xi32>
    %c0_i32_5 = arith.constant 0 : i32
    %22 = vector.broadcast %c0_i32_5 : i32 to vector<32x128xi32>
    %23 = arith.cmpi slt, %19, %22 : vector<32x128xi32>
    %c0_i32_6 = arith.constant 0 : i32
    %24 = arith.cmpi slt, %17, %c0_i32_6 : i32
    %25 = vector.broadcast %24 : i1 to vector<32x128xi1>
    %26 = vector.broadcast %25 : vector<32x128xi1> to vector<32x128xi1>
    %27 = arith.xori %23, %26 : vector<32x128xi1>
    %28 = arith.andi %27, %21 : vector<32x128xi1>
    %29 = vector.broadcast %17 : i32 to vector<32x128xi32>
    %30 = arith.addi %19, %29 : vector<32x128xi32>
    %31 = arith.select %28, %30, %19 : vector<32x128xi1>, vector<32x128xi32>
    %c0_i32_7 = arith.constant 0 : i32
    %32 = vector.broadcast %c0_i32_7 : i32 to vector<32x128xi32>
    %33 = arith.cmpi eq, %31, %32 : vector<32x128xi32>
    %cst_8 = arith.constant 1.000000e+00 : f32
    %34 = vector.broadcast %cst_8 : f32 to vector<32x128xf32>
    %35 = arith.cmpf oeq, %15, %34 : vector<32x128xf32>
    %36 = arith.andi %33, %35 : vector<32x128xi1>
    %37 = arith.extui %36 : vector<32x128xi1> to vector<32x128xi32>
    %38 = arith.sitofp %37 : vector<32x128xi32> to vector<32x128xf32>
    %39 = math.absf %13 : vector<32x128xf32>
    %cst_9 = arith.constant 0.000000e+00 : f32
    %40 = vector.broadcast %cst_9 : f32 to vector<32x128xf32>
    %41 = arith.subf %40, %39 : vector<32x128xf32>
    %42 = math.exp %41 : vector<32x128xf32>
    %cst_10 = arith.constant 0.000000e+00 : f32
    %43 = vector.broadcast %cst_10 : f32 to vector<32x128xf32>
    %44 = arith.maximumf %13, %43 : vector<32x128xf32>
    %45 = arith.mulf %13, %15 : vector<32x128xf32>
    %46 = arith.subf %44, %45 : vector<32x128xf32>
    %47 = math.log1p %42 : vector<32x128xf32>
    %48 = arith.addf %46, %47 : vector<32x128xf32>
    %49 = arith.mulf %48, %38 : vector<32x128xf32>
    %cst_11 = arith.constant 1.000000e+00 : f32
    %50 = vector.broadcast %cst_11 : f32 to vector<32x128xf32>
    %51 = arith.addf %50, %42 : vector<32x128xf32>
    %cst_12 = arith.constant 1.000000e+00 : f32
    %52 = vector.broadcast %cst_12 : f32 to vector<32x128xf32>
    %53 = arith.divf %52, %51 : vector<32x128xf32>
    %cst_13 = arith.constant 0.000000e+00 : f32
    %54 = vector.broadcast %cst_13 : f32 to vector<32x128xf32>
    %55 = arith.cmpf oge, %13, %54 : vector<32x128xf32>
    %56 = arith.mulf %42, %53 : vector<32x128xf32>
    %57 = arith.select %55, %53, %56 : vector<32x128xi1>, vector<32x128xf32>
    %58 = arith.mulf %57, %38 : vector<32x128xf32>
    %c1_i32_14 = arith.constant 1 : i32
    %59 = tpu.dynamic_rotate %58 by %c1_i32_14 dim 1 : vector<32x128xf32>, i32 -> vector<32x128xf32>
    %c2_i32 = arith.constant 2 : i32
    %60 = tpu.dynamic_rotate %58 by %c2_i32 dim 1 : vector<32x128xf32>, i32 -> vector<32x128xf32>
    %61 = arith.addf %59, %60 : vector<32x128xf32>
    %c3_i32 = arith.constant 3 : i32
    %62 = tpu.dynamic_rotate %58 by %c3_i32 dim 1 : vector<32x128xf32>, i32 -> vector<32x128xf32>
    %63 = arith.addf %61, %62 : vector<32x128xf32>
    %64 = arith.subf %13, %15 : vector<32x128xf32>
    %65 = arith.mulf %64, %64 : vector<32x128xf32>
    %66 = arith.mulf %65, %63 : vector<32x128xf32>
    %cst_15 = arith.constant 0.333333343 : f32
    %67 = vector.broadcast %cst_15 : f32 to vector<32x128xf32>
    %68 = arith.mulf %66, %67 : vector<32x128xf32>
    %cst_16 = arith.constant dense<0.000000e+00> : vector<128xf32>
    %69 = vector.multi_reduction <add>, %49, %cst_16 [0] : vector<32x128xf32> to vector<128xf32>
    %70 = vector.shape_cast %69 : vector<128xf32> to vector<1x128xf32>
    %c0_17 = arith.constant 0 : index
    %c0_18 = arith.constant 0 : index
    %c0_19 = arith.constant 0 : index
    %71 = vector.load %arg3[%c0_17, %c0_18, %c0_19] : memref<1x8x128xf32, #tpu.memory_space<vmem>>, vector<1x1x128xf32>
    %72 = vector.shape_cast %71 : vector<1x1x128xf32> to vector<1x128xf32>
    %73 = vector.shape_cast %70 : vector<1x128xf32> to vector<1x1x128xf32>
    tpu.vector_store %arg3[%c0_17, %c0_18, %c0_19], %73 {strides = array<i32>} : memref<1x8x128xf32, #tpu.memory_space<vmem>>, vector<1x1x128xf32>,
    %cst_20 = arith.constant dense<0.000000e+00> : vector<128xf32>
    %74 = vector.multi_reduction <add>, %68, %cst_20 [0] : vector<32x128xf32> to vector<128xf32>
    %75 = vector.shape_cast %74 : vector<128xf32> to vector<1x128xf32>
    %c0_21 = arith.constant 0 : index
    %c1 = arith.constant 1 : index
    %c0_22 = arith.constant 0 : index
    %76 = vector.load %arg3[%c0_21, %c1, %c0_22] : memref<1x8x128xf32, #tpu.memory_space<vmem>>, vector<1x1x128xf32>
    %77 = vector.shape_cast %76 : vector<1x1x128xf32> to vector<1x128xf32>
    %78 = vector.shape_cast %75 : vector<1x128xf32> to vector<1x1x128xf32>
    tpu.vector_store %arg3[%c0_21, %c1, %c0_22], %78 {strides = array<i32>} : memref<1x8x128xf32, #tpu.memory_space<vmem>>, vector<1x1x128xf32>,
    %cst_23 = arith.constant dense<0.000000e+00> : vector<128xf32>
    %79 = vector.multi_reduction <add>, %38, %cst_23 [0] : vector<32x128xf32> to vector<128xf32>
    %80 = vector.shape_cast %79 : vector<128xf32> to vector<1x128xf32>
    %c0_24 = arith.constant 0 : index
    %c2 = arith.constant 2 : index
    %c0_25 = arith.constant 0 : index
    %81 = vector.load %arg3[%c0_24, %c2, %c0_25] : memref<1x8x128xf32, #tpu.memory_space<vmem>>, vector<1x1x128xf32>
    %82 = vector.shape_cast %81 : vector<1x1x128xf32> to vector<1x128xf32>
    %83 = vector.shape_cast %80 : vector<1x128xf32> to vector<1x1x128xf32>
    tpu.vector_store %arg3[%c0_24, %c2, %c0_25], %83 {strides = array<i32>} : memref<1x8x128xf32, #tpu.memory_space<vmem>>, vector<1x1x128xf32>,
    %cst_26 = arith.constant 0.000000e+00 : f32
    %84 = vector.broadcast %cst_26 : f32 to vector<5x128xf32>
    %c0_27 = arith.constant 0 : index
    %c3 = arith.constant 3 : index
    %c0_28 = arith.constant 0 : index
    %85 = vector.load %arg3[%c0_27, %c3, %c0_28] : memref<1x8x128xf32, #tpu.memory_space<vmem>>, vector<1x5x128xf32>
    %86 = vector.shape_cast %85 : vector<1x5x128xf32> to vector<5x128xf32>
    %87 = vector.shape_cast %84 : vector<5x128xf32> to vector<1x5x128xf32>
    tpu.vector_store %arg3[%c0_27, %c3, %c0_28], %87 {strides = array<i32>} : memref<1x8x128xf32, #tpu.memory_space<vmem>>, vector<1x5x128xf32>,
    return
  }
  func.func @transform_0(%arg0: i32) -> (i32, i32) {
    %c0_i32 = arith.constant 0 : i32
    %c0_i32_0 = arith.constant 0 : i32
    return %arg0, %c0_i32 : i32, i32
  }
  func.func @transform_1(%arg0: i32) -> (i32, i32) {
    %c0_i32 = arith.constant 0 : i32
    %c0_i32_0 = arith.constant 0 : i32
    return %arg0, %c0_i32 : i32, i32
  }
  func.func @transform_2(%arg0: i32) -> (i32, i32, i32) {
    %c0_i32 = arith.constant 0 : i32
    %c0_i32_0 = arith.constant 0 : i32
    %c0_i32_1 = arith.constant 0 : i32
    return %arg0, %c0_i32, %c0_i32_0 : i32, i32, i32
  }
}

</mosaic_0001>

<bundles_post_ra>
// kernel: single_traffic_position_loss.1
= control target key start
LH: loop header
LB: loop body
LE: loop exit
PB: predicated region body
PF: predicated region fallthrough
CT: control target
= control target key end

     0   :  { %s560_s9 = smov 0   ;;  %s736_s0 = inlined_call_operand.vmem [shape: f32[64,128], index: 0, kind: input, shape index: {}]   ;;  %s737_s1 = inlined_call_operand.vmem [shape: f32[64,128], index: 1, kind: input, shape index: {}]   ;;  %s738_s2 = inlined_call_operand.vmem [shape: f32[2,8,128], index: 2, kind: output, shape index: {}]  }
   0x1 LB: > { %s480_s10 = sadd.s32 4294967295, %s539_s9   ;;  %p484_p0 = scmp.ge.s32.totalorder %s539_s9, 1  ;;  %s539_s9 = sphi %s560_s9, %s12_s9  }
   0x2   : > { %p124_p1 = scmp.lt.s32.totalorder %s539_s9, 3 }
   0x4   : > { %p125_p2 = pnand %p484_p0, %p124_p1 }
   0x5   : > { %s485_s11 = sshll.u32 (!%p125_p2), %s480_s10, 2  ;;  %p162_p3 = scmp.lt.s32.totalorder (!%p125_p2), %s480_s10, 1  ;;  %v174_v0 = vlaneseq (!%p125_p2)  ;;  %v541_v9 = vmov (!%p125_p2), 0.0  }
   0x6   : > { %128 = sbr.rel (%p125_p2) target bundleno = 211 (0xd3), region = 28  ;;  %p151_p4 = scmp.lt.s32.totalorder (!%p125_p2), %s485_s11, 7 }
   0x7   : > { %s490_s12 = sshll.u32 (!%p125_p2), %s480_s10, 5  ;;  %v175_v1 = vshrl.u32 (!%p125_p2), %v174_v0, 7  ;;  %v180_v3 = vand.u32 (!%p125_p2), 127, %v174_v0  ;;  %s542_s24 = smov (!%p125_p2), 2  }
   0x8   : > { %v182_v2 = vstv (!%p125_p2), %s490_s12  ;;  %s543_s25 = smov (!%p125_p2), 1   ;;  %s544_s26 = smov (!%p125_p2), 3  }
   0x9   : > { %v183_v4 = vadd.s32 (!%p125_p2), %v182_v2, %v175_v1  ;;  %v176_v5 = vadd.s32 (!%p125_p2), 8, %v175_v1  ;;  %v177_v6 = vadd.s32 (!%p125_p2), 16, %v175_v1  ;;  %v178_v7 = vadd.s32 (!%p125_p2), 24, %v175_v1 }
   0xa   : > { %v211_v16 = vand.u32 (!%p125_p2), 3, %v180_v3 }
   0xb   : > { %v187_v8 = vmul.u32 (!%p125_p2), 128, %v183_v4  ;;  %v184_v10 = vadd.s32 (!%p125_p2), %v182_v2, %v176_v5  ;;  %v185_v11 = vadd.s32 (!%p125_p2), %v182_v2, %v177_v6  ;;  %v186_v12 = vadd.s32 (!%p125_p2), %v182_v2, %v178_v7 }
   0xc   : > { %vm591_vm1 = vcmp.eq.s32.totalorder (!%p125_p2), %v211_v16, 0 }
   0xd   : > { %s748_s10 = smov (!%p162_p3, %s480_s10), 1  ;;  %s750_s11 = smov (!%p151_p4, %s485_s11), 7  ;;  %v191_v15 = vadd.s32 %v187_v8, %v180_v3  ;;  %v188_v17 = vmul.u32 128, %v184_v10  ;;  %v189_v18 = vmul.u32 128, %v185_v11 }
   0xe   : > { %s489_s13 = sshll.u32 %s748_s10, 3  ;;  %s486_s14 = sshll.u32 %s750_s11, 3  ;;  %v190_v19 = vmul.u32 128, %v186_v12 }
   0xf   : > { %s571_s17 = scalar_lea.vmem %s738_s2, %s489_s13  ;;  %s576_s20 = scalar_lea.vmem %s736_s0, %s486_s14  ;;  %vm195_vm0 = vcmp.lt.s32.totalorder %v191_v15, 8192  ;;  %v192_v20 = vadd.s32 %v188_v17, %v180_v3  ;;  %v193_v21 = vadd.s32 %v189_v18, %v180_v3 }
  0x10   : > { %s581_s23 = scalar_lea.vmem %s737_s1, %s486_s14  ;;  %414 = vst [vmem:[%s571_s17 + $0x3] sm:$0x1f] %v541_v9  ;;  %v166_v13 = vld [vmem:[%s576_s20] sm:$0xff]  ;;  %v167_v24 = vld [vmem:[%s576_s20 + $0x8] sm:$0xff]  ;;  %v168_v28 = vld [vmem:[%s576_s20 + $0x10] sm:$0xff]  ;;  %v194_v29 = vadd.s32 %v190_v19, %v180_v3 }
  0x11   : > { %v170_v14 = vld [vmem:[%s581_s23] sm:$0xff]  ;;  %v586_v22 = vsel %vm195_vm0, %v166_v13, 0.0  ;;  %v171_v27 = vld [vmem:[%s581_s23 + $0x8] sm:$0xff]  ;;  %vm196_vm3 = vcmp.lt.s32.totalorder %v192_v20, 8192  ;;  %vm197_vm4 = vcmp.lt.s32.totalorder %v193_v21, 8192  ;;  %v172_v32 = vld [vmem:[%s581_s23 + $0x10] sm:$0xff] }
  0x12   : > { %v588_v23 = vsel %vm195_vm0, %v170_v14, 0.0  ;;  %v236_v26 = vand.u32 2147483647, %v586_v22  ;;  %v599_v31 = vsel %vm196_vm3, %v167_v24, 0.0  ;;  %v604_v33 = vsel %vm196_vm3, %v171_v27, 0.0  ;;  %v169_v37 = vld [vmem:[%s576_s20 + $0x18] sm:$0xff] }
  0x13   : > { %vm220_vm2 = vcmp.eq.f32.partialorder %v588_v23, 1.0  ;;  %v237_v34 = vand.u32 2147483647, %v599_v31  ;;  %vm221_vm6 = vcmp.eq.f32.partialorder %v604_v33, 1.0  ;;  %v608_v36 = vsel %vm197_vm4, %v168_v28, 0.0  ;;  %v173_v41 = vld [vmem:[%s581_s23 + $0x18] sm:$0xff] }
  0x14   : > { %v240_v30 = vsub.f32 0.0, %v236_v26  ;;  %vm224_vm5 = vmand %vm591_vm1, %vm220_vm2  ;;  %v613_v39 = vsel %vm197_vm4, %v172_v32, 0.0  ;;  %v238_v40 = vand.u32 2147483647, %v608_v36  ;;  %vm198_vm8 = vcmp.lt.s32.totalorder %v194_v29, 8192 }
  0x15   : > { %vm225_vm7 = vmand %vm591_vm1, %vm221_vm6  ;;  %v241_v38 = vsub.f32 0.0, %v237_v34  ;;  %v617_v42 = vsel %vm224_vm5, 1.0, %v541_v9  ;;  %vm222_vm9 = vcmp.eq.f32.partialorder %v613_v39, 1.0  ;;  %v628_v48 = vsel %vm198_vm8, %v169_v37, 0.0 }
  0x16   : > { %v244_v35 = vmul.f32 1.442695, %v240_v30  ;;  %v619_v43 = vsel %vm225_vm7, 1.0, %v541_v9  ;;  %vm226_vm10 = vmand %vm591_vm1, %vm222_vm9  ;;  %v242_v46 = vsub.f32 0.0, %v238_v40  ;;  %v630_v49 = vsel %vm198_vm8, %v173_v41, 0.0 }
  0x17   : > { %v246_v44 = vmul.f32 1.442695, %v241_v38  ;;  %v404_v45 = vadd.f32 %v619_v43, %v617_v42  ;;  %v626_v47 = vsel %vm226_vm10, 1.0, %v541_v9  ;;  %vm223_vm11 = vcmp.eq.f32.partialorder %v630_v49, 1.0 }
  0x18   : > { %509 = vpow2.f32 %v244_v35  ;;  %v248_v50 = vmul.f32 1.442695, %v242_v46  ;;  %v239_v52 = vand.u32 2147483647, %v628_v48  ;;  %vm227_vm12 = vmand %vm591_vm1, %vm223_vm11  ;;  %v252_v3 = vmax.f32 %v586_v22, 0.0 }
  0x19   : > { %511 = vpow2.f32 %v246_v44  ;;  %v405_v51 = vadd.f32 %v626_v47, %v404_v45  ;;  %v637_v53 = vsel %vm227_vm12, 1.0, %v541_v9  ;;  %v256_v4 = vmul.f32 %v588_v23, %v586_v22 }
  0x1a   : > { %513 = vpow2.f32 %v248_v50  ;;  %v243_v54 = vsub.f32 0.0, %v239_v52  ;;  %v648_v9 = vsub.f32 %v586_v22, %v588_v23  ;;  %vm320_vm13 = vcmp.ge.f32.partialorder %v586_v22, 0.0 }
  0x1b   : > { %v406_v55 = vadd.f32 %v637_v53, %v405_v51  ;;  %v260_v14 = vsub.f32 %v252_v3, %v256_v4  ;;  %v253_v15 = vmax.f32 %v599_v31, 0.0  ;;  %v257_v16 = vmul.f32 %v604_v33, %v599_v31 }
  0x1c   : > { %v250_v56 = vmul.f32 1.442695, %v243_v54  ;;  %vm321_vm14 = vcmp.ge.f32.partialorder %v599_v31, 0.0  ;;  %v254_v21 = vmax.f32 %v608_v36, 0.0  ;;  %v258_v23 = vmul.f32 %v613_v39, %v608_v36 }
  0x1d   : > { %v407_v57 = vrot.slane %v406_v55, 4  ;;  %v671_v32 = vsub.f32 %v599_v31, %v604_v33  ;;  %v261_v35 = vsub.f32 %v253_v15, %v257_v16  ;;  %vm322_vm0 = vcmp.ge.f32.partialorder %v608_v36, 0.0 }
  0x1e   : > { %515 = vpow2.f32 %v250_v56  ;;  %v262_v44 = vsub.f32 %v254_v21, %v258_v23  ;;  %v255_v45 = vmax.f32 %v628_v48, 0.0  ;;  %v371_v15 = vsub.f32 %v628_v48, %v630_v49 }
  0x1f   : > { %v408_v60 = vadd.f32 %v407_v57, %v406_v55  ;;  %vm323_vm4 = vcmp.ge.f32.partialorder %v628_v48, 0.0 }
  0x21   : > { %v409_v62 = vrot.slane %v408_v60, 2 }
  0x22   : > { %v510_v58 = vpop.eup %509 }
  0x23   : > { %v264_v59 = vadd.f32 1.0, %v510_v58  ;;  %v512_v61 = vpop.eup %511  ;;  %v267_v1 = vmul.f32 -0.5, %v510_v58  ;;  %v410_v2 = vadd.f32 %v409_v62, %v408_v60  ;;  %v270_v8 = vand.u32 2147483647, %v510_v58 }
  0x24   : > { %v273_v63 = vadd.f32 1.0, %v512_v61  ;;  %v640_v0 = vpop.eup %513  ;;  %v276_v6 = vmul.f32 -0.5, %v512_v61  ;;  %v279_v20 = vand.u32 2147483647, %v512_v61  ;;  %v259_v62 = vmul.f32 %v630_v49, %v628_v48 }
  0x25   : > { %517 = vrcp.f32 %v264_v59  ;;  %v282_v5 = vadd.f32 1.0, %v640_v0  ;;  %v411_v7 = vrot.slane %v410_v2, 1  ;;  %v268_v10 = vadd.f32 1.0, %v267_v1 }
  0x26   : > { %519 = vlog2.f32 %v264_v59  ;;  %v285_v11 = vmul.f32 -0.5, %v640_v0  ;;  %v277_v17 = vadd.f32 1.0, %v276_v6  ;;  %vm660_vm15 = vcmp.lt.f32.partialorder %v270_v8, 0.0004427343 }
  0x27   : > { %521 = vlog2.f32 %v273_v63  ;;  %v412_v12 = vadd.f32 %v411_v7, %v410_v2  ;;  %v269_v25 = vmul.f32 %v510_v58, %v268_v10  ;;  %v288_v27 = vand.u32 2147483647, %v640_v0 }
  0x28   : > { %523 = vrcp.f32 %v273_v63  ;;  %v651_v13 = vpop.eup %515  ;;  %v286_v26 = vadd.f32 1.0, %v285_v11  ;;  %v278_v37 = vmul.f32 %v512_v61, %v277_v17  ;;  %vm676_vm1 = vcmp.lt.f32.partialorder %v279_v20, 0.0004427343 }
  0x29   : > { %525 = vlog2.f32 %v282_v5  ;;  %v291_v18 = vadd.f32 1.0, %v651_v13  ;;  %413 = vst [vmem:[%s571_s17 + $0x2] sm:$0x1] %v412_v12  ;;  %v294_v30 = vmul.f32 -0.5, %v651_v13  ;;  %vm685_vm2 = vcmp.lt.f32.partialorder %v288_v27, 0.0004427343 }
  0x2a   : > { %527 = vrcp.f32 %v282_v5  ;;  %v287_v52 = vmul.f32 %v640_v0, %v286_v26  ;;  %v370_v17 = vsub.f32 %v608_v36, %v613_v39 }
  0x2b   : > { %529 = vlog2.f32 %v291_v18  ;;  %v295_v57 = vadd.f32 1.0, %v294_v30 }
  0x2c   : > { %531 = vrcp.f32 %v291_v18 }
  0x2d   : > { %v296_v10 = vmul.f32 %v651_v13, %v295_v57 }
  0x2f   : > { %v518_v24 = vpop.eup %517 }
  0x30   : > { %v520_v28 = vpop.eup %519  ;;  %v324_v29 = vmul.f32 %v518_v24, %v510_v58 }
  0x31   : > { %v266_v34 = vmul.f32 0.6931472, %v520_v28  ;;  %v522_v38 = vpop.eup %521 }
  0x32   : > { %v328_v40 = vsel %vm320_vm13, %v518_v24, %v324_v29  ;;  %v524_v46 = vpop.eup %523  ;;  %v275_v51 = vmul.f32 0.6931472, %v522_v38 }
  0x33   : > { %v332_v33 = vmul.f32 %v617_v42, %v328_v40  ;;  %v272_v50 = vsel %vm660_vm15, %v269_v25, %v266_v34  ;;  %v526_v54 = vpop.eup %525  ;;  %v325_v22 = vmul.f32 %v524_v46, %v512_v61  ;;  %v297_v61 = vand.u32 2147483647, %v651_v13 }
  0x34   : > { %v300_v55 = vadd.f32 %v272_v50, %v260_v14  ;;  %v528_v58 = vpop.eup %527  ;;  %v281_v59 = vsel %vm676_vm1, %v278_v37, %v275_v51  ;;  %v284_v60 = vmul.f32 0.6931472, %v526_v54  ;;  %v373_v40 = vmul.f32 %v671_v32, %v671_v32 }
  0x35   : > { %344 = vrot.lane.b32.xlu1 %v332_v33, %s542_s24  ;;  %336 = vrot.lane.b32.xlu0 %v332_v33, %s543_s25  ;;  %v301_v1 = vadd.f32 %v281_v59, %v261_v35  ;;  %v329_v2 = vsel %vm321_vm14, %v524_v46, %v325_v22  ;;  %v326_v3 = vmul.f32 %v528_v58, %v640_v0  ;;  %vm298_vm3 = vcmp.lt.f32.partialorder %v297_v61, 0.0004427343 }
  0x36   : > { %v304_v63 = vmul.f32 %v617_v42, %v300_v55  ;;  %v333_v4 = vmul.f32 %v619_v43, %v329_v2  ;;  %v290_v5 = vsel %vm685_vm2, %v287_v52, %v284_v60  ;;  %v530_v42 = vpop.eup %529  ;;  %v263_v0 = vsub.f32 %v255_v45, %v259_v62 }
  0x37   : > { %v305_v6 = vmul.f32 %v619_v43, %v301_v1  ;;  %v302_v7 = vadd.f32 %v290_v5, %v262_v44  ;;  %v330_v8 = vsel %vm322_vm0, %v528_v58, %v326_v3  ;;  %v532_v11 = vpop.eup %531  ;;  %v293_v14 = vmul.f32 0.6931472, %v530_v42 }
  0x38   : > { %v334_v31 = vmul.f32 %v626_v47, %v330_v8  ;;  %v327_v16 = vmul.f32 %v532_v11, %v651_v13  ;;  %v372_v35 = vmul.f32 %v648_v9, %v648_v9  ;;  %v375_v55 = vmul.f32 %v371_v15, %v371_v15 }
  0x39   : > { %346 = vrot.lane.b32.xlu1 %v333_v4, %s542_s24  ;;  %356 = vrot.lane.b32.xlu0 %v332_v33, %s544_s26  ;;  %v384_v12 = vadd.f32 %v305_v6, %v304_v63  ;;  %v306_v43 = vmul.f32 %v626_v47, %v302_v7  ;;  %v299_v18 = vsel %vm298_vm3, %v296_v10, %v293_v14 }
  0x3a   : > { %v303_v20 = vadd.f32 %v299_v18, %v263_v0  ;;  %v331_v21 = vsel %vm323_vm4, %v532_v11, %v327_v16  ;;  %v374_v58 = vmul.f32 %v370_v17, %v370_v17 }
  0x3b   : > { %v385_v19 = vadd.f32 %v384_v12, %v306_v43  ;;  %v335_v48 = vmul.f32 %v637_v53, %v331_v21 }
  0x3c   : > { %v307_v47 = vmul.f32 %v637_v53, %v303_v20 }
  0x3d   : > { %348 = vrot.lane.b32.xlu1 %v334_v31, %s542_s24  ;;  %338 = vrot.lane.b32.xlu0 %v333_v4, %s543_s25 }
  0x3e   : > { %v386_v49 = vadd.f32 %v385_v19, %v307_v47 }
  0x40   : > { %v387_v13 = vrot.slane %v386_v49, 4 }
  0x41   : > { %358 = vrot.lane.b32.xlu1 %v333_v4, %s544_s26  ;;  %340 = vrot.lane.b32.xlu0 %v334_v31, %s543_s25 }
  0x42   : > { %v388_v36 = vadd.f32 %v387_v13, %v386_v49 }
  0x44   : > { %v389_v39 = vrot.slane %v388_v36, 2 }
  0x45   : > { %350 = vrot.lane.b32.xlu1 %v335_v48, %s542_s24  ;;  %342 = vrot.lane.b32.xlu0 %v335_v48, %s543_s25 }
  0x46   : > { %v390_v23 = vadd.f32 %v389_v39, %v388_v36 }
  0x48   : > { %v391_v24 = vrot.slane %v390_v23, 1 }
  0x49   : > { %362 = vrot.lane.b32.xlu1 %v335_v48, %s544_s26  ;;  %360 = vrot.lane.b32.xlu0 %v334_v31, %s544_s26 }
  0x4a   : > { %v392_v25 = vadd.f32 %v391_v24, %v390_v23 }
  0x4c   : > { %393 = vst [vmem:[%s571_s17] sm:$0x1] %v392_v25 }
  0xa7   : > { %v345_v26 = vpop.permute.xlu1 %344  ;;  %v337_v27 = vpop.permute.xlu0 %336 }
  0xa8   : > { %v352_v29 = vadd.f32 %v345_v26, %v337_v27 }
  0xab   : > { %v347_v28 = vpop.permute.xlu1 %346  ;;  %v357_v53 = vpop.permute.xlu0 %356 }
  0xac   : > { %v364_v37 = vadd.f32 %v357_v53, %v352_v29 }
  0xae   : > { %v376_v45 = vmul.f32 %v372_v35, %v364_v37 }
  0xaf   : > { %v349_v30 = vpop.permute.xlu1 %348  ;;  %v339_v34 = vpop.permute.xlu0 %338 }
  0xb0   : > { %v353_v38 = vadd.f32 %v347_v28, %v339_v34  ;;  %v380_v52 = vmul.f32 0.33333334, %v376_v45 }
  0xb3   : > { %v359_v41 = vpop.permute.xlu1 %358  ;;  %v341_v44 = vpop.permute.xlu0 %340 }
  0xb4   : > { %v365_v46 = vadd.f32 %v359_v41, %v353_v38  ;;  %v354_v56 = vadd.f32 %v349_v30, %v341_v44 }
  0xb6   : > { %v377_v33 = vmul.f32 %v373_v40, %v365_v46 }
  0xb7   : > { %v351_v50 = vpop.permute.xlu1 %350  ;;  %v343_v51 = vpop.permute.xlu0 %342 }
  0xb8   : > { %v381_v54 = vmul.f32 0.33333334, %v377_v33  ;;  %v355_v57 = vadd.f32 %v351_v50, %v343_v51 }
  0xba   : > { %v394_v22 = vadd.f32 %v381_v54, %v380_v52 }
  0xbb   : > { %v363_v9 = vpop.permute.xlu1 %362  ;;  %v361_v59 = vpop.permute.xlu0 %360 }
  0xbc   : > { %v367_v60 = vadd.f32 %v363_v9, %v355_v57  ;;  %v366_v62 = vadd.f32 %v361_v59, %v354_v56 }
  0xbe   : > { %v379_v32 = vmul.f32 %v375_v55, %v367_v60  ;;  %v378_v61 = vmul.f32 %v374_v58, %v366_v62 }
  0xc0   : > { %v382_v63 = vmul.f32 0.33333334, %v378_v61  ;;  %v383_v1 = vmul.f32 0.33333334, %v379_v32 }
  0xc2   : > { %v395_v2 = vadd.f32 %v394_v22, %v382_v63 }
  0xc4   : > { %v396_v3 = vadd.f32 %v395_v2, %v383_v1 }
  0xc6   : > { %v397_v4 = vrot.slane %v396_v3, 4 }
  0xc8   : > { %v398_v5 = vadd.f32 %v397_v4, %v396_v3 }
  0xca   : > { %v399_v6 = vrot.slane %v398_v5, 2 }
  0xcc   : > { %v400_v7 = vadd.f32 %v399_v6, %v398_v5 }
  0xce   : > { %v401_v8 = vrot.slane %v400_v7, 1 }
  0xd0   : > { %v402_v10 = vadd.f32 %v401_v8, %v400_v7 }
  0xd2   : > { %403 = vst [vmem:[%s571_s17 + $0x1] sm:$0x1] %v402_v10 }
  0xd3 PF: > { %s12_s9 = sadd.s32 1, %s539_s9  }
  0xd4   : > { %p9_p5 = scmp.ge.s32.totalorder %s12_s9, 4  }
  0xd6   :  { %11 = sbr.rel (!%p9_p5) target bundleno = 1 (0x1), region = 61 }

</bundles_post_ra>
